<compile_context>
chip_gen: v7x
topology: tpu7x:2x2x1
jax: 0.10.0
libtpu: 0.0.40
codegen_flags: <defaults>
</compile_context>

<pallas_src>
import jax
import jax.numpy as jnp
from jax import lax
from jax.experimental import pallas as pl
from jax.experimental.pallas import tpu as pltpu


_NEG_BIG = -1e30   # finite "-inf" for padded vocab columns (exp() underflows to 0)
_MIB = 1024 * 1024


def _round_up(x: int, m: int) -> int:
    return (x + m - 1) // m * m


def _chip_traits():
    """(mxu_edge, two_tensorcores) heuristics from the attached TPU generation."""
    kind = ""
    try:
        kind = jax.devices()[0].device_kind.lower()
    except Exception:
        pass
    if any(v in kind for v in ("v2", "v3", "v4", "v5")):
        return 128, False            # 128-wide MXU tiles, single TensorCore
    if "v6" in kind:
        return 256, False            # 256-wide MXU, single TensorCore
    return 256, True                 # v7x / unknown future: 256-wide MXU, 2 TCs


def _default_vmem_limit_bytes() -> int:
    """Scoped-VMEM limit: physical capacity minus a single headroom margin."""
    try:
        cap = pltpu.get_tpu_info().vmem_capacity_bytes   # 128 MiB v5e/v6e, 64 MiB v7x
    except Exception:
        kind = ""
        try:
            kind = jax.devices()[0].device_kind.lower()
        except Exception:
            pass
        cap = 128 * _MIB if any(v in kind for v in ("v5", "v6")) else 64 * _MIB
    return int(min(cap - 8 * _MIB, 100 * _MIB))


def _pick_tv(vp: int, tv_max: int) -> int:
    """Largest multiple of 128 that divides vp and is <= max(tv_max, 128)."""
    q = vp // 128
    for d in range(max(1, min(q, max(tv_max, 128) // 128)), 0, -1):
        if q % d == 0:
            return 128 * d
    return 128


def _auto_tiles(M, H, V, c_size, o_size, vmem_limit_bytes, mxu_edge, two_cores):
    """Pick (tm, tv). tv == round_up(V,128) selects the fused single-pass kernel."""
    budget = max(vmem_limit_bytes - 2 * _MIB, 4 * _MIB)   # no double-derating
    vp = _round_up(V, 128)
    sub = 16 if c_size == 2 else 8            # bf16 packs 16 sublanes per vreg

    # Fused path cost: single-buffered whole W + f32 bias, per-row-tile buffers.
    fused_const = vp * H * c_size + vp * 4
    fused_row = 2 * H * c_size + 2 * vp * o_size + vp * 4   # x, out (dbl-buf), f32 temp
    min_tm = min(_round_up(M, sub), 2 * sub)

    if fused_const + min_tm * fused_row <= budget:
        tv = vp
        tm_budget = (budget - fused_const) // fused_row
    else:
        # Lane-dense vocab tile that divides vp (no extra vocab padding).
        tv = _pick_tv(vp, 2048)
        const = 2 * tv * H * c_size + 2 * tv * 4            # dbl-buffered W / bias tiles
        row = 2 * H * c_size + 2 * tv * 4 + tv * 4 + 16     # x, f32 logits out, temp, norm
        tm_budget = (budget - const) // row

    tm = int(max(sub, min(tm_budget, 512)))
    if tm >= mxu_edge:
        tm = tm // mxu_edge * mxu_edge        # align the row tile to the MXU edge
    else:
        tm = _round_up(tm, sub)
    if two_cores and M > tm:                  # v7x only: keep both TensorCores fed
        tm = min(tm, max(sub, _round_up(-(-M // 2), sub)))
    tm = min(tm, _round_up(M, sub))
    return _round_up(tm, sub), int(tv)


def _fused_head_kernel(x_ref, w_ref, b_ref, out_ref):
    """out = log_softmax(x @ W + b) for one row tile; whole vocab resident."""
    logits = jnp.dot(x_ref[...], w_ref[...],
                     preferred_element_type=jnp.float32) + b_ref[...]
    m = jnp.max(logits, axis=-1, keepdims=True)
    shifted = logits - m
    lse = jnp.log(jnp.sum(jnp.exp(shifted), axis=-1, keepdims=True))
    out_ref[...] = (shifted - lse).astype(out_ref.dtype)


def _logits_lse_kernel(x_ref, w_ref, b_ref, logits_ref, norm_ref, m_sc, l_sc):
    """Pass 1 (V-tiled): raw logits tile to HBM + online row-wise logsumexp."""
    j = pl.program_id(1)

    @pl.when(j == 0)
    def _():
        m_sc[...] = jnp.full(m_sc.shape, -jnp.inf, dtype=m_sc.dtype)
        l_sc[...] = jnp.zeros(l_sc.shape, dtype=l_sc.dtype)

    logits = jnp.dot(x_ref[...], w_ref[...],
                     preferred_element_type=jnp.float32) + b_ref[...]
    logits_ref[...] = logits                 # single matmul pass: store raw logits

    m_prev = m_sc[...]
    m_new = jnp.maximum(m_prev, jnp.max(logits, axis=-1, keepdims=True))
    l_sc[...] = (l_sc[...] * jnp.exp(m_prev - m_new)
                 + jnp.sum(jnp.exp(logits - m_new), axis=-1, keepdims=True))
    m_sc[...] = m_new

    @pl.when(j == pl.num_programs(1) - 1)
    def _():
        norm_ref[...] = m_sc[...] + jnp.log(l_sc[...])


def _normalize_kernel(logits_ref, norm_ref, out_ref):
    """Pass 2 (V-tiled): matmul-free 'logits - logsumexp' normalize."""
    out_ref[...] = (logits_ref[...] - norm_ref[...]).astype(out_ref.dtype)


def masked_log_model(x_flat, weight, bias, *, tm=None, tv=None,
                     compute_dtype=jnp.bfloat16, out_dtype=jnp.float32,
                     vmem_limit_bytes=None):
    """MaskedLogModel: log_softmax(x_flat @ weight.T + bias, axis=-1).

    x_flat: [M, H] hidden states, weight: [V, H] (torch nn.Linear layout),
    bias: [V].  Returns [M, V] log-probabilities in out_dtype.  Passing
    out_dtype=jnp.bfloat16 halves the dominant [M, V] HBM writeback.
    """
    M, H = x_flat.shape
    V, H_w = weight.shape
    assert H_w == H and bias.shape == (V,)

    if vmem_limit_bytes is None:
        vmem_limit_bytes = _default_vmem_limit_bytes()
    vmem_limit_bytes = int(vmem_limit_bytes)

    mxu_edge, two_cores = _chip_traits()
    c_size = jnp.dtype(compute_dtype).itemsize
    o_size = jnp.dtype(out_dtype).itemsize
    auto_tm, auto_tv = _auto_tiles(M, H, V, c_size, o_size, vmem_limit_bytes,
                                   mxu_edge, two_cores)
    sub = 16 if c_size == 2 else 8
    vp = _round_up(V, 128)

    tm = auto_tm if tm is None else int(tm)
    tm = min(_round_up(max(sub, min(tm, 512)), sub), _round_up(M, sub))
    tv = auto_tv if tv is None else _pick_tv(vp, int(tv))

    mp = _round_up(M, tm)
    nm, nv = mp // tm, vp // tv

    # Pad rows (zeros) and vocab (zero weight rows, "-inf" bias) to tile multiples.
    x_p = x_flat if mp == M else jnp.pad(x_flat, ((0, mp - M), (0, 0)))
    if vp == V:
        w_p, b_p = weight, bias
    else:
        w_p = jnp.pad(weight, ((0, vp - V), (0, 0)))
        b_p = jnp.pad(bias, ((0, vp - V),), constant_values=_NEG_BIG)

    x_c = x_p.astype(compute_dtype)
    # One-time HBM transpose of the torch-layout [V,H] weight to [H,V]: keeps the
    # MXU RHS lane dim == vocab (lane-dense) and avoids per-tile weight relayouts.
    w_c = w_p.astype(compute_dtype).T
    b_f = b_p.astype(jnp.float32).reshape(1, vp)

    if nv == 1:
        # Fused single-pass head: whole (padded) vocab resident in VMEM.
        # TODO(synk): optional fp8 weight quantization on v7x (full-rate fp8 MXU)
        # would roughly double the vocab size that still fits this fused path.
        out = pl.pallas_call(
            _fused_head_kernel,
            out_shape=jax.ShapeDtypeStruct((mp, vp), out_dtype),
            grid=(nm,),
            in_specs=[
                pl.BlockSpec((tm, H), lambda i: (i, 0)),
                # Grid-invariant W / bias: whole-array, single-buffered VMEM residents.
                pl.BlockSpec(memory_space=pltpu.MemorySpace.VMEM),
                pl.BlockSpec(memory_space=pltpu.MemorySpace.VMEM),
            ],
            out_specs=pl.BlockSpec((tm, vp), lambda i: (i, 0)),
            compiler_params=pltpu.CompilerParams(
                dimension_semantics=("parallel",),
                vmem_limit_bytes=vmem_limit_bytes),
        )(x_c, w_c, b_f)
    else:
        # Large vocab: ONE matmul pass (raw logits + online logsumexp per row),
        # then a matmul-free elementwise normalize.  W is streamed once per row
        # tile only; tm is budget-grown to keep nm (and W re-streams) small.
        logits, norm = pl.pallas_call(
            _logits_lse_kernel,
            out_shape=(jax.ShapeDtypeStruct((mp, vp), jnp.float32),
                       jax.ShapeDtypeStruct((mp, 1), jnp.float32)),
            grid=(nm, nv),
            in_specs=[
                pl.BlockSpec((tm, H), lambda i, j: (i, 0)),
                pl.BlockSpec((H, tv), lambda i, j: (0, j)),
                pl.BlockSpec((1, tv), lambda i, j: (0, j)),
            ],
            out_specs=[
                pl.BlockSpec((tm, tv), lambda i, j: (i, j)),
                pl.BlockSpec((tm, 1), lambda i, j: (i, 0)),
            ],
            scratch_shapes=[pltpu.VMEM((tm, 1), jnp.float32),
                            pltpu.VMEM((tm, 1), jnp.float32)],
            compiler_params=pltpu.CompilerParams(
                dimension_semantics=("parallel", "arbitrary"),
                vmem_limit_bytes=vmem_limit_bytes),
        )(x_c, w_c, b_f)

        alias = {0: 0} if jnp.dtype(out_dtype) == jnp.dtype(jnp.float32) else {}
        out = pl.pallas_call(
            _normalize_kernel,
            out_shape=jax.ShapeDtypeStruct((mp, vp), out_dtype),
            grid=(nm, nv),
            in_specs=[
                pl.BlockSpec((tm, tv), lambda i, j: (i, j)),
                pl.BlockSpec((tm, 1), lambda i, j: (i, 0)),
            ],
            out_specs=pl.BlockSpec((tm, tv), lambda i, j: (i, j)),
            input_output_aliases=alias,      # normalize the logits in place
            compiler_params=pltpu.CompilerParams(
                dimension_semantics=("parallel", "parallel"),
                vmem_limit_bytes=vmem_limit_bytes),
        )(logits, norm)

    if mp == M and vp == V:
        return out
    return out[:M, :V]


def bert_log_forward(x, mask_lm_weight, mask_lm_bias, **head_kwargs):
    """Mirrors BERTLog.forward after the external self.bert(x, time_info) call."""
    # TODO(synk): the BERT encoder is an externally supplied submodule in the
    # spec; this wrapper consumes its output hidden states x: [B, S, H].
    B, S, H = x.shape
    V = mask_lm_weight.shape[0]
    logkey = masked_log_model(x.reshape(B * S, H), mask_lm_weight, mask_lm_bias,
                              **head_kwargs).reshape(B, S, V)
    return {
        "logkey_output": logkey,
        # TODO(synk): time_lm is constructed in BERTLog.__init__ but never
        # called in forward, so time_output stays None (matches PyTorch code).
        "time_output": None,
        "cls_output": x[:, 0],
        "cls_fnn_output": None,
    }


if __name__ == "__main__":
    B, S, H, V = 2, 8, 32, 128

    key = jax.random.PRNGKey(0)
    k_x, k_w, k_b, k_x2, k_w2, k_b2 = jax.random.split(key, 6)

    x = jax.random.normal(k_x, (B, S, H), dtype=jnp.float32)
    w = jax.random.normal(k_w, (V, H), dtype=jnp.float32) / jnp.sqrt(float(H))
    b = 0.5 * jax.random.normal(k_b, (V,), dtype=jnp.float32)

    result = bert_log_forward(x, w, b)
    jax.block_until_ready(result["logkey_output"])
    jax.block_until_ready(result["cls_output"])

    ref_logits = jnp.dot(x.reshape(-1, H), w.T,
                         precision=lax.Precision.HIGHEST) + b
    ref = jax.nn.log_softmax(ref_logits, axis=-1).reshape(B, S, V)

    out = result["logkey_output"]
    # default path uses bf16 inputs/weight (f32 accumulate) -> loose tolerance
    assert jnp.allclose(out, ref, atol=1e-1, rtol=0.0), \
        float(jnp.max(jnp.abs(out - ref)))
    # rows of log-probs must be normalized (sum of exp == 1)
    assert jnp.max(jnp.abs(jax.scipy.special.logsumexp(out, axis=-1))) < 1e-3
    assert jnp.allclose(result["cls_output"], x[:, 0])

    # f32-compute fused path: tighter check of the kernel math.
    out_f32 = masked_log_model(x.reshape(-1, H), w, b, compute_dtype=jnp.float32)
    jax.block_until_ready(out_f32)
    assert jnp.allclose(out_f32.reshape(B, S, V), ref, atol=2e-2, rtol=0.0)
    assert jnp.max(jnp.abs(jax.scipy.special.logsumexp(out_f32, axis=-1))) < 1e-3

    # bf16-output fast path (halves the [M, V] writeback).
    out_bf16 = masked_log_model(x.reshape(-1, H), w, b, out_dtype=jnp.bfloat16)
    jax.block_until_ready(out_bf16)
    assert jnp.allclose(out_bf16.astype(jnp.float32).reshape(B, S, V), ref,
                        atol=2.5e-1, rtol=0.0)

    # Large-vocab (V-tiled, single-matmul + elementwise normalize) path with
    # row and vocab padding exercised.
    M2, V2 = 20, 300
    x2 = jax.random.normal(k_x2, (M2, H), dtype=jnp.float32)
    w2 = jax.random.normal(k_w2, (V2, H), dtype=jnp.float32) / jnp.sqrt(float(H))
    b2 = 0.5 * jax.random.normal(k_b2, (V2,), dtype=jnp.float32)
    out2 = masked_log_model(x2, w2, b2, tm=16, tv=128, compute_dtype=jnp.float32)
    jax.block_until_ready(out2)
    ref2 = jax.nn.log_softmax(
        jnp.dot(x2, w2.T, precision=lax.Precision.HIGHEST) + b2, axis=-1)
    assert jnp.allclose(out2, ref2, atol=2e-2, rtol=0.0), \
        float(jnp.max(jnp.abs(out2 - ref2)))
    assert jnp.max(jnp.abs(jax.scipy.special.logsumexp(out2, axis=-1))) < 1e-3

    print("KERNEL_OK")
</pallas_src>

<mosaic_0001>
module attributes {stable_mosaic.version = 11 : i64} {
  func.func @_fused_head_kernel(%arg0: i32, %arg1: memref<16x32xbf16, #tpu.memory_space<vmem>>, %arg2: memref<32x128xbf16, #tpu.memory_space<vmem>>, %arg3: memref<1x128xf32, #tpu.memory_space<vmem>>, %arg4: memref<16x128xf32, #tpu.memory_space<vmem>>) attributes {dimension_semantics = [#tpu.dimension_semantics<parallel>], iteration_bounds = array<i64: 1>, scalar_prefetch = 0 : i64, scratch_operands = 0 : i64, tpu.core_type = #tpu.core_type<tc>, window_params = [{transform_indices = @transform_0, window_bounds = array<i64: 16, 32>}, {pipeline_mode = #tpu.pipeline_mode<synchronous>, transform_indices = @transform_1, window_bounds = array<i64: 32, 128>}, {pipeline_mode = #tpu.pipeline_mode<synchronous>, transform_indices = @transform_2, window_bounds = array<i64: 1, 128>}, {transform_indices = @transform_3, window_bounds = array<i64: 16, 128>}]} {
    %c0 = arith.constant 0 : index
    %c0_0 = arith.constant 0 : index
    %0 = vector.load %arg1[%c0, %c0_0] : memref<16x32xbf16, #tpu.memory_space<vmem>>, vector<16x32xbf16>
    %c0_1 = arith.constant 0 : index
    %c0_2 = arith.constant 0 : index
    %1 = vector.load %arg2[%c0_1, %c0_2] : memref<32x128xbf16, #tpu.memory_space<vmem>>, vector<32x128xbf16>
    %cst = arith.constant dense<0.000000e+00> : vector<16x128xf32>
    %2 = tpu.matmul %0, %1, %cst {dimension_numbers = #tpu.dot_dimension_numbers<[1], [0], [0], [1], [0, 0, 1, 1], [], []>} : vector<16x32xbf16>, vector<32x128xbf16>, vector<16x128xf32> -> vector<16x128xf32>
    %c0_3 = arith.constant 0 : index
    %c0_4 = arith.constant 0 : index
    %3 = vector.load %arg3[%c0_3, %c0_4] : memref<1x128xf32, #tpu.memory_space<vmem>>, vector<1x128xf32>
    %4 = vector.broadcast %3 : vector<1x128xf32> to vector<16x128xf32>
    %5 = arith.addf %2, %4 : vector<16x128xf32>
    %cst_5 = arith.constant dense<0xFF800000> : vector<16xf32>
    %6 = vector.multi_reduction <maximumf>, %5, %cst_5 [1] : vector<16x128xf32> to vector<16xf32>
    %7 = vector.shape_cast %6 : vector<16xf32> to vector<16x1xf32>
    %8 = vector.broadcast %7 : vector<16x1xf32> to vector<16x128xf32>
    %9 = arith.subf %5, %8 : vector<16x128xf32>
    %10 = math.exp %9 : vector<16x128xf32>
    %cst_6 = arith.constant dense<0.000000e+00> : vector<16xf32>
    %11 = vector.multi_reduction <add>, %10, %cst_6 [1] : vector<16x128xf32> to vector<16xf32>
    %12 = vector.shape_cast %11 : vector<16xf32> to vector<16x1xf32>
    %13 = math.log %12 : vector<16x1xf32>
    %14 = vector.broadcast %13 : vector<16x1xf32> to vector<16x128xf32>
    %15 = arith.subf %9, %14 : vector<16x128xf32>
    %c0_7 = arith.constant 0 : index
    %c0_8 = arith.constant 0 : index
    %16 = vector.load %arg4[%c0_7, %c0_8] : memref<16x128xf32, #tpu.memory_space<vmem>>, vector<16x128xf32>
    tpu.vector_store %arg4[%c0_7, %c0_8], %15 {strides = array<i32>} : memref<16x128xf32, #tpu.memory_space<vmem>>, vector<16x128xf32>,
    return
  }
  func.func @transform_0(%arg0: i32) -> (i32, i32) {
    %c0_i32 = arith.constant 0 : i32
    %c0_i32_0 = arith.constant 0 : i32
    return %arg0, %c0_i32 : i32, i32
  }
  func.func @transform_1(%arg0: i32) -> (i32, i32) {
    %c0_i32 = arith.constant 0 : i32
    %c0_i32_0 = arith.constant 0 : i32
    %c0_i32_1 = arith.constant 0 : i32
    return %c0_i32, %c0_i32_0 : i32, i32
  }
  func.func @transform_2(%arg0: i32) -> (i32, i32) {
    %c0_i32 = arith.constant 0 : i32
    %c0_i32_0 = arith.constant 0 : i32
    %c0_i32_1 = arith.constant 0 : i32
    return %c0_i32, %c0_i32_0 : i32, i32
  }
  func.func @transform_3(%arg0: i32) -> (i32, i32) {
    %c0_i32 = arith.constant 0 : i32
    %c0_i32_0 = arith.constant 0 : i32
    return %arg0, %c0_i32 : i32, i32
  }
}

</mosaic_0001>

<bundles_post_ra>
// kernel: tpu_custom_call.1
= control target key start
LH: loop header
LB: loop body
LE: loop exit
PB: predicated region body
PF: predicated region fallthrough
CT: control target
= control target key end

     0   :  { %8 = vsyncpa [#allocation3], 0  ;;  %s335_s0 = inlined_call_operand.hbm [shape: bf16[16,32], index: 0, kind: input, shape index: {}]   ;;  %s336_s1 = inlined_call_operand.hbm [shape: bf16[32,128], index: 1, kind: input, shape index: {}]   ;;  %s337_s2 = inlined_call_operand.vmem [shape: f32[1,128], index: 2, kind: input, shape index: {}]   ;;  %s338_s3 = inlined_call_operand.hbm [shape: f32[16,128], index: 3, kind: output, shape index: {}]  }
   0x1   :  { %9 = vsyncpa [#allocation6], 0 }
   0x2   :  { %10 = vsyncpa [#allocation4], 0  ;;  %s267_s12 = smov [#allocation2]   ;;  %s195_s16 = scalar_lea.hbm %s335_s0, 128 }
   0x3   :  { %s16_s13 = sshll.u32 %s267_s12, 4  ;;  %p196_p0 = scmp.ne.s32.totalorder %s335_s0, %s195_s16  ;;  %s17_s13 = int_to_ptr.vmem [resolvable:$true] %s16_s13 }
   0x4   :  { %p199_p1 = scmp.lt.u32.totalorder %s195_s16, %s335_s0 }
   0x6   :  { %p201_p2 = pnand %p199_p1, %p196_p0 }
   0x8   :  { %204 = shalt.err (!%p201_p2)
}
   0x9   :  { %s205_s21 = scalar_lea.vmem %s17_s13, 128  ;;  %p210_p4 = scmp.lt.s32.totalorder %s17_s13, %s17_s13 }
   0xa   :  { %p206_p3 = scmp.ne.s32.totalorder %s17_s13, %s205_s21  ;;  %p211_p5 = scmp.lt.s32.totalorder %s205_s21, %s205_s21 }
   0xc   :  { %p212_p6 = por %p211_p5, %p210_p4 }
   0xe   :  { %p213_p7 = pnand %p212_p6, %p206_p3 }
  0x10   :  { %216 = shalt.err (!%p213_p7)
}
  0x11   :  { %s268_s22 = smov 64   ;;  %s269_s23 = smov 4  }
  0x12   :  { %22 = dma.hbm_to_vmem [thread:$0]  %s335_s0, 128, %s17_s13, [#allocation3], %s268_s22, %s268_s22, %s269_s23  }
  0x13   :  { %s270_s26 = smov [#allocation5]   ;;  %s217_s30 = scalar_lea.hbm %s336_s1, 256 }
  0x14   :  { %s28_s27 = sshll.u32 %s270_s26, 4  ;;  %p218_p8 = scmp.ne.s32.totalorder %s336_s1, %s217_s30  ;;  %s29_s27 = int_to_ptr.vmem [resolvable:$true] %s28_s27 }
  0x15   :  { %p221_p9 = scmp.lt.u32.totalorder %s217_s30, %s336_s1 }
  0x17   :  { %p223_p10 = pnand %p221_p9, %p218_p8 }
  0x19   :  { %226 = shalt.err (!%p223_p10)
}
  0x1a   :  { %s227_s8 = scalar_lea.vmem %s29_s27, 256  ;;  %p232_p12 = scmp.lt.s32.totalorder %s29_s27, %s29_s27 }
  0x1b   :  { %p228_p11 = scmp.ne.s32.totalorder %s29_s27, %s227_s8  ;;  %p233_p13 = scmp.lt.s32.totalorder %s227_s8, %s227_s8 }
  0x1d   :  { %p234_p0 = por %p233_p13, %p232_p12 }
  0x1f   :  { %p235_p1 = pnand %p234_p0, %p228_p11 }
  0x21   :  { %238 = shalt.err (!%p235_p1)
}
  0x22   :  { %34 = dma.hbm_to_vmem [thread:$0]  %s336_s1, 256, %s29_s27, [#allocation6], %s268_s22, %s268_s22, %s269_s23  }
  0x23   :  { %261 = dma.done.wait [#allocation3], 128  }
  0x24   :  { %262 = vsyncadd [#allocation3], 4294967168 }
  0x25   :  { %263 = dma.done.wait [#allocation6], 256  }
  0x26   :  { %264 = vsyncadd [#allocation6], 4294967040  ;;  %v271_v0 = vmov 0.0   ;;  %vm272_vm0 = vmmov 0   ;;  %v184_v1 = vld [vmem:[#allocation5] sm:$0xff]   ;;  %v185_v2 = vld [vmem:[#allocation5 + $0x8] sm:$0xff]  }
  0x27   :  { %167 = vmatprep.subr.bf16.mxu0 %v271_v0  ;;  %171 = vmatprep.mubr.msk.bf16.mxu0 %vm272_vm0, %v271_v0  ;;  %v186_v3 = vld [vmem:[#allocation2] sm:$0xff]   ;;  %vm74_vm1 = vcmask 261120   ;;  %s273_s1 = smov [#allocation7]  }
  0x28   :  { %168 = vmatpush3.bf16.msra.mxu0 %v184_v1  ;;  %v159_v4 = vld [vmem:[%s337_s2] ss:$0 sm:$0xff]  ;;  %s146_s2 = sshll.u32 %s273_s1, 4  ;;  %s147_s2 = int_to_ptr.vmem [resolvable:$true] %s146_s2 }
  0x29   :  { %169 = vmatprep.subr.bf16.mxu0 %v271_v0  ;;  %s239_s12 = scalar_lea.vmem %s147_s2, 256  ;;  %p244_p3 = scmp.lt.s32.totalorder %s147_s2, %s147_s2 }
  0x2a   :  { %p240_p2 = scmp.ne.s32.totalorder %s147_s2, %s239_s12  ;;  %p245_p4 = scmp.lt.s32.totalorder %s239_s12, %s239_s12 }
  0x2c   :  { %170 = vmatpush3.bf16.msra.mxu0 %v185_v2  ;;  %p246_p5 = por %p245_p4, %p244_p3 }
  0x2e   :  { %p247_p6 = pnand %p246_p5, %p240_p2 }
  0x2f   :  { %172 = vmatmul.mubr.msk.bf16.vlgmr.msra.gmra.mrb[0].mxu0 %vm74_vm1, %v186_v3 }
 0x102   :  { %v112_v5 = vpop.f32.mrb[0].mxu0 }
 0x103   :  { %v113_v6 = vadd.f32 %v159_v4, %v112_v5  ;;  %v173_v7 = vpop.f32.mrb[1].mxu0 }
 0x104   :  { %v115_v8 = vpop.f32.mrb[2].mxu0 }
 0x105   :  { %119 = vmax.xlane.f32.xlu0 %v113_v6  ;;  %v174_v9 = vpop.f32.mrb[3].mxu0  ;;  %v116_v10 = vadd.f32 %v159_v4, %v115_v8 }
 0x109   :  { %121 = vmax.xlane.f32.xlu0 %v116_v10 }
 0x192   :  { %v120_v11 = vpop.xlane.xlu0 %119 }
 0x193   :  { %v123_v12 = vsub.f32 %v113_v6, %v120_v11 }
 0x195   :  { %v125_v13 = vmul.f32 1.442695, %v123_v12 }
 0x196   :  { %v122_v14 = vpop.xlane.xlu0 %121 }
 0x197   :  { %v124_v15 = vsub.f32 %v116_v10, %v122_v14  ;;  %187 = vpow2.f32 %v125_v13 }
 0x199   :  { %v127_v16 = vmul.f32 1.442695, %v124_v15 }
 0x19b   :  { %189 = vpow2.f32 %v127_v16 }
 0x1a1   :  { %v188_v17 = vpop.eup %187 }
 0x1a2   :  { %129 = vadd.xlane.f32.xlu1 %v188_v17 }
 0x1a5   :  { %v190_v18 = vpop.eup %189 }
 0x1a6   :  { %131 = vadd.xlane.f32.xlu1 %v190_v18 }
 0x22f   :  { %v130_v19 = vpop.xlane.xlu1 %129 }
 0x230   :  { %191 = vlog2.f32 %v130_v19 }
 0x233   :  { %v132_v20 = vpop.xlane.xlu1 %131 }
 0x234   :  { %193 = vlog2.f32 %v132_v20 }
 0x23a   :  { %v192_v21 = vpop.eup %191 }
 0x23b   :  { %v134_v22 = vmul.f32 0.6931472, %v192_v21 }
 0x23d   :  { %v137_v23 = vsub.f32 %v123_v12, %v134_v22 }
 0x23e   :  { %v194_v24 = vpop.eup %193 }
 0x23f   :  { %139 = vst [vmem:[#allocation7] sm:$0xff] %v137_v23  ;;  %v136_v25 = vmul.f32 0.6931472, %v194_v24 }
 0x241   :  { %v138_v26 = vsub.f32 %v124_v15, %v136_v25 }
 0x243   :  { %140 = vst [vmem:[#allocation7 + $0x8] sm:$0xff] %v138_v26 }
 0x244   :  { %250 = shalt.err (!%p247_p6)
}
 0x245   :  { %s251_s15 = scalar_lea.hbm %s338_s3, 256 }
 0x246   :  { %p252_p7 = scmp.ne.s32.totalorder %s338_s3, %s251_s15  ;;  %p255_p8 = scmp.lt.u32.totalorder %s251_s15, %s338_s3 }
 0x248   :  { %p257_p9 = pnand %p255_p8, %p252_p7 }
 0x24a   :  { %260 = shalt.err (!%p257_p9)
}
 0x24b   :  { %s274_s20 = smov 128   ;;  %s275_s21 = smov 8  }
 0x24c   :  { %152 = dma.vmem_to_hbm [thread:$0]  %s147_s2, 256, %s338_s3, [#allocation4], %s274_s20, %s274_s20, %s275_s21  }
 0x24d   :  { %265 = dma.done.wait [#allocation4], 256  }
 0x24e   :  { %266 = vsyncadd [#allocation4], 4294967040 }
 0x24f   :  { %156 = vsyncpa [#allocation3], 1 }
 0x250   :  { %157 = vsyncpa [#allocation6], 1 }
 0x251   :  { %158 = vsyncpa [#allocation4], 1 }

</bundles_post_ra>
